<compile_context>
chip_gen: v5e
topology: v5e:2x2
jax: 0.10.0
libtpu: 0.0.40
codegen_flags: <defaults>
</compile_context>

<pallas_src>
import math

import numpy as np
import jax
import jax.numpy as jnp
from jax.experimental import pallas as pl
from jax.experimental.pallas import tpu as pltpu

# ----------------------------- config -------------------------------------
B = 2          # batch
T = 8          # sequence length (== block_size)
C = 32         # n_embd
NH = 4         # n_head
HD = C // NH   # head dim
BT = B * T     # flattened rows
LN_EPS = 1e-5
NEG_INF = -1e30

# --------------------- packed-parameter slab layouts ------------------------
# vec_slab: (VEC_ROWS, 128) f32 — LN params, biases, additive causal-mask bias
ROW_LN1_G, ROW_LN1_B, ROW_LN2_G, ROW_LN2_B = 0, 1, 2, 3
ROW_B_AO, ROW_B_MO, ROW_B_FC, ROW_B_QKV = 4, 5, 6, 7
ROW_MASK = 8                    # rows 8:8+BT, lanes 0:BT : additive mask bias
VEC_ROWS = 24

# w_slab: (W_ROWS, 128) bf16 — lane-dense weight slab
ROW_W_FC = 0     # rows   0:32, lanes 0:128 : w_fc  (C, 4C)
ROW_W_MO = 32    # rows  32:64, lanes 32j:32j+32 : w_mo[32j:32j+32, :] block j
ROW_W_QKV = 64   # rows  64:96, lanes 0:96  : [wq*scale | wk | wv]  (C, 3C)
ROW_W_O = 96     # rows 96:128, lanes 0:32  : w_ao  (C, C)
W_ROWS = 128


# ----------------------------- kernel -------------------------------------
def _layernorm(x, gamma, beta):
    mean = jnp.mean(x, axis=-1, keepdims=True)
    var = jnp.mean((x - mean) ** 2, axis=-1, keepdims=True)
    return (x - mean) * jax.lax.rsqrt(var + LN_EPS) * gamma + beta


def _gelu_tanh(x):
    c = math.sqrt(2.0 / math.pi)
    return 0.5 * x * (1.0 + jnp.tanh(c * (x + 0.044715 * x * x * x)))


def block_kernel(x_ref, vec_ref, w_ref, o_ref):
    f32 = jnp.float32
    bf16 = jnp.bfloat16
    x = x_ref[...].astype(f32)                               # (BT, C)

    # ---------------- ln_1 + causal self-attention ----------------
    ln1_g = vec_ref[ROW_LN1_G:ROW_LN1_G + 1, :C]
    ln1_b = vec_ref[ROW_LN1_B:ROW_LN1_B + 1, :C]
    h1 = _layernorm(x, ln1_g, ln1_b)                         # (BT, C) f32

    # fused QKV projection: one (16,32)@(32,96) MXU push
    w_qkv = w_ref[ROW_W_QKV:ROW_W_QKV + C, :3 * C]           # (C, 3C) bf16
    b_qkv = vec_ref[ROW_B_QKV:ROW_B_QKV + 1, :3 * C]         # (1, 3C) f32
    qkv = jnp.dot(h1.astype(bf16), w_qkv,
                  preferred_element_type=f32) + b_qkv        # (BT, 3C) f32

    # precomputed additive block-diagonal causal mask (0 / -1e30)
    mask_bias = vec_ref[ROW_MASK:ROW_MASK + BT, :BT]         # (BT, BT) f32

    y_heads = []
    for h in range(NH):                                      # NH=4, unrolled
        qh = qkv[:, 0 * C + h * HD: 0 * C + (h + 1) * HD]    # (BT, HD), pre-scaled
        kh = qkv[:, 1 * C + h * HD: 1 * C + (h + 1) * HD]
        vh = qkv[:, 2 * C + h * HD: 2 * C + (h + 1) * HD]

        s = jax.lax.dot_general(qh.astype(bf16), kh.astype(bf16),
                                (((1,), (1,)), ((), ())),
                                preferred_element_type=f32)  # (BT, BT)
        s = s + mask_bias
        s = s - jnp.max(s, axis=-1, keepdims=True)
        p = jnp.exp(s)
        p = p * pl.reciprocal(jnp.sum(p, axis=-1, keepdims=True), approx=True)

        yh = jnp.dot(p.astype(bf16), vh.astype(bf16),
                     preferred_element_type=f32)             # (BT, HD)
        y_heads.append(yh)

    y = jnp.concatenate(y_heads, axis=-1)                    # (BT, C)
    w_o = w_ref[ROW_W_O:ROW_W_O + C, :C]                     # (C, C) bf16
    b_ao = vec_ref[ROW_B_AO:ROW_B_AO + 1, :C]
    att = jnp.dot(y.astype(bf16), w_o, preferred_element_type=f32) + b_ao

    x = x + att                                              # residual 1

    # ---------------- ln_2 + MLP ----------------
    ln2_g = vec_ref[ROW_LN2_G:ROW_LN2_G + 1, :C]
    ln2_b = vec_ref[ROW_LN2_B:ROW_LN2_B + 1, :C]
    h2 = _layernorm(x, ln2_g, ln2_b)

    w_fc = w_ref[ROW_W_FC:ROW_W_FC + C, :]                   # (C, 4C) bf16
    b_fc = vec_ref[ROW_B_FC:ROW_B_FC + 1, :]                 # (1, 4C) f32
    hf = jnp.dot(h2.astype(bf16), w_fc, preferred_element_type=f32) + b_fc
    hf = _gelu_tanh(hf)                                      # (BT, 4C) f32
    hf_b = hf.astype(bf16)

    # w_mo packed as four (C,C) column blocks side-by-side in lanes 0:128
    b_mo = vec_ref[ROW_B_MO:ROW_B_MO + 1, :C]
    m = b_mo
    for j in range(4):
        m = m + jnp.dot(hf_b[:, C * j: C * (j + 1)],
                        w_ref[ROW_W_MO:ROW_W_MO + C, C * j: C * (j + 1)],
                        preferred_element_type=f32)          # (BT, C)

    o_ref[...] = (x + m).astype(o_ref.dtype)                 # residual 2


# ----------------------------- host-side packing ---------------------------
def pack_params(params):
    """Pack the 12 small parameter arrays into two lane-dense slabs."""
    (ln1_g, ln1_b, w_qkv, b_qkv, w_ao, b_ao,
     ln2_g, ln2_b, w_fc, b_fc, w_mo, b_mo) = [np.asarray(p, np.float32) for p in params]

    scale = 1.0 / math.sqrt(HD)

    vec = np.zeros((VEC_ROWS, 128), np.float32)
    vec[ROW_LN1_G, :C] = ln1_g.reshape(-1)
    vec[ROW_LN1_B, :C] = ln1_b.reshape(-1)
    vec[ROW_LN2_G, :C] = ln2_g.reshape(-1)
    vec[ROW_LN2_B, :C] = ln2_b.reshape(-1)
    vec[ROW_B_AO, :C] = b_ao.reshape(-1)
    vec[ROW_B_MO, :C] = b_mo.reshape(-1)
    vec[ROW_B_FC, :4 * C] = b_fc.reshape(-1)
    bqkv = b_qkv.reshape(-1)
    vec[ROW_B_QKV, :C] = bqkv[:C] * scale          # q bias, attention scale folded in
    vec[ROW_B_QKV, C:3 * C] = bqkv[C:3 * C]        # k, v biases

    # additive block-diagonal causal mask over the flattened (B*T) rows
    row = np.arange(BT)[:, None]
    col = np.arange(BT)[None, :]
    mask = (col <= row) & ((row // T) == (col // T))
    vec[ROW_MASK:ROW_MASK + BT, :BT] = np.where(mask, 0.0, NEG_INF)

    w = np.zeros((W_ROWS, 128), np.float32)
    w[ROW_W_FC:ROW_W_FC + C, :4 * C] = w_fc                           # (32, 128)
    for j in range(4):                                                # w_mo column blocks
        w[ROW_W_MO:ROW_W_MO + C, C * j: C * (j + 1)] = w_mo[C * j: C * (j + 1), :]
    w[ROW_W_QKV:ROW_W_QKV + C, 0:C] = w_qkv[:, 0:C] * scale           # wq (pre-scaled)
    w[ROW_W_QKV:ROW_W_QKV + C, C:3 * C] = w_qkv[:, C:3 * C]           # wk | wv
    w[ROW_W_O:ROW_W_O + C, :C] = w_ao                                 # (32, 32)

    return jnp.asarray(vec, jnp.float32), jnp.asarray(w, jnp.bfloat16)


# ----------------------------- wrapper -------------------------------------
@jax.jit
def transformer_block(x, vec_slab, w_slab):
    x2 = x.reshape(BT, C)                                    # metadata-only reshape
    out = pl.pallas_call(
        block_kernel,
        out_shape=jax.ShapeDtypeStruct((BT, C), x.dtype),
        grid_spec=pltpu.PrefetchScalarGridSpec(
            num_scalar_prefetch=0,
            grid=(1,),
            in_specs=[pl.BlockSpec((BT, C), lambda i: (0, 0)),
                      pl.BlockSpec((VEC_ROWS, 128), lambda i: (0, 0)),
                      pl.BlockSpec((W_ROWS, 128), lambda i: (0, 0))],
            out_specs=pl.BlockSpec((BT, C), lambda i: (0, 0)),
        ),
        compiler_params=pltpu.CompilerParams(
            dimension_semantics=("arbitrary",)),
    )(x2, vec_slab, w_slab)
    return out.reshape(B, T, C)
    # TODO(synk): if this block is stacked L times per step, add a leading
    # "layer" grid axis over per-layer slabs to amortize the pallas_call cost.


# ----------------------------- reference (pure JAX) -------------------------
def reference_block(x, params):
    (ln1_g, ln1_b, w_qkv, b_qkv, w_ao, b_ao,
     ln2_g, ln2_b, w_fc, b_fc, w_mo, b_mo) = params

    def ln(z, g, b):
        mu = jnp.mean(z, -1, keepdims=True)
        var = jnp.mean((z - mu) ** 2, -1, keepdims=True)
        return (z - mu) / jnp.sqrt(var + LN_EPS) * g + b

    h = ln(x, ln1_g, ln1_b)
    qkv = h @ w_qkv + b_qkv
    q, k, v = jnp.split(qkv, 3, axis=-1)
    q = q.reshape(B, T, NH, HD).transpose(0, 2, 1, 3)
    k = k.reshape(B, T, NH, HD).transpose(0, 2, 1, 3)
    v = v.reshape(B, T, NH, HD).transpose(0, 2, 1, 3)
    att = (q @ jnp.swapaxes(k, -2, -1)) / math.sqrt(HD)
    mask = jnp.tril(jnp.ones((T, T), bool))
    att = jnp.where(mask[None, None], att, -jnp.inf)
    att = jax.nn.softmax(att, axis=-1)
    y = (att @ v).transpose(0, 2, 1, 3).reshape(B, T, C)
    y = y @ w_ao + b_ao
    x = x + y

    h = ln(x, ln2_g, ln2_b)
    hf = h @ w_fc + b_fc
    c = math.sqrt(2.0 / math.pi)
    hf = 0.5 * hf * (1.0 + jnp.tanh(c * (hf + 0.044715 * hf ** 3)))
    m = hf @ w_mo + b_mo
    return x + m


# ----------------------------- main -----------------------------------------
if __name__ == "__main__":
    key = jax.random.PRNGKey(0)
    keys = jax.random.split(key, 8)

    x = jax.random.normal(keys[0], (B, T, C), jnp.float32)

    ln1_g = jnp.ones((1, C), jnp.float32)
    ln1_b = jnp.zeros((1, C), jnp.float32)
    w_qkv = 0.02 * jax.random.normal(keys[1], (C, 3 * C), jnp.float32)
    b_qkv = 0.01 * jax.random.normal(keys[2], (1, 3 * C), jnp.float32)
    w_ao = 0.02 * jax.random.normal(keys[3], (C, C), jnp.float32)
    b_ao = 0.01 * jax.random.normal(keys[4], (1, C), jnp.float32)
    ln2_g = jnp.ones((1, C), jnp.float32)
    ln2_b = jnp.zeros((1, C), jnp.float32)
    w_fc = 0.02 * jax.random.normal(keys[5], (C, 4 * C), jnp.float32)
    b_fc = 0.01 * jax.random.normal(keys[6], (1, 4 * C), jnp.float32)
    w_mo = 0.02 * jax.random.normal(keys[7], (4 * C, C), jnp.float32)
    b_mo = jnp.zeros((1, C), jnp.float32)

    params = (ln1_g, ln1_b, w_qkv, b_qkv, w_ao, b_ao,
              ln2_g, ln2_b, w_fc, b_fc, w_mo, b_mo)

    vec_slab, w_slab = pack_params(params)   # host-side, once

    out = transformer_block(x, vec_slab, w_slab)
    out = jax.block_until_ready(out)

    ref = reference_block(x, params)
    assert out.shape == (B, T, C)
    assert jnp.max(jnp.abs(out - ref)) < 2e-3, "mismatch vs pure-JAX reference"

    print("KERNEL_OK")
</pallas_src>

<mosaic_0001>
module attributes {stable_mosaic.version = 11 : i64} {
  func.func @block_kernel(%arg0: i32, %arg1: memref<16x32xf32, #tpu.memory_space<vmem>>, %arg2: memref<24x128xf32, #tpu.memory_space<vmem>>, %arg3: memref<128x128xbf16, #tpu.memory_space<vmem>>, %arg4: memref<16x32xf32, #tpu.memory_space<vmem>>) attributes {dimension_semantics = [#tpu.dimension_semantics<arbitrary>], iteration_bounds = array<i64: 1>, scalar_prefetch = 0 : i64, scratch_operands = 0 : i64, tpu.core_type = #tpu.core_type<tc>, window_params = [{pipeline_mode = #tpu.pipeline_mode<synchronous>, transform_indices = @transform_0, window_bounds = array<i64: 16, 32>}, {pipeline_mode = #tpu.pipeline_mode<synchronous>, transform_indices = @transform_1, window_bounds = array<i64: 24, 128>}, {pipeline_mode = #tpu.pipeline_mode<synchronous>, transform_indices = @transform_2, window_bounds = array<i64: 128, 128>}, {pipeline_mode = #tpu.pipeline_mode<synchronous>, transform_indices = @transform_3, window_bounds = array<i64: 16, 32>}]} {
    %c0 = arith.constant 0 : index
    %c0_0 = arith.constant 0 : index
    %0 = vector.load %arg1[%c0, %c0_0] : memref<16x32xf32, #tpu.memory_space<vmem>>, vector<16x32xf32>
    %c0_1 = arith.constant 0 : index
    %c0_2 = arith.constant 0 : index
    %1 = vector.load %arg2[%c0_1, %c0_2] : memref<24x128xf32, #tpu.memory_space<vmem>>, vector<1x32xf32>
    %c1 = arith.constant 1 : index
    %c0_3 = arith.constant 0 : index
    %2 = vector.load %arg2[%c1, %c0_3] : memref<24x128xf32, #tpu.memory_space<vmem>>, vector<1x32xf32>
    %cst = arith.constant dense<0.000000e+00> : vector<16xf32>
    %3 = vector.multi_reduction <add>, %0, %cst [1] : vector<16x32xf32> to vector<16xf32>
    %4 = vector.shape_cast %3 : vector<16xf32> to vector<16x1xf32>
    %cst_4 = arith.constant 3.200000e+01 : f32
    %5 = vector.broadcast %cst_4 : f32 to vector<16x1xf32>
    %6 = arith.divf %4, %5 : vector<16x1xf32>
    %7 = vector.broadcast %6 : vector<16x1xf32> to vector<16x32xf32>
    %8 = arith.subf %0, %7 : vector<16x32xf32>
    %9 = arith.mulf %8, %8 : vector<16x32xf32>
    %cst_5 = arith.constant dense<0.000000e+00> : vector<16xf32>
    %10 = vector.multi_reduction <add>, %9, %cst_5 [1] : vector<16x32xf32> to vector<16xf32>
    %11 = vector.shape_cast %10 : vector<16xf32> to vector<16x1xf32>
    %cst_6 = arith.constant 3.200000e+01 : f32
    %12 = vector.broadcast %cst_6 : f32 to vector<16x1xf32>
    %13 = arith.divf %11, %12 : vector<16x1xf32>
    %14 = vector.broadcast %6 : vector<16x1xf32> to vector<16x32xf32>
    %15 = arith.subf %0, %14 : vector<16x32xf32>
    %cst_7 = arith.constant 9.99999974E-6 : f32
    %16 = vector.broadcast %cst_7 : f32 to vector<16x1xf32>
    %17 = arith.addf %13, %16 : vector<16x1xf32>
    %18 = math.rsqrt %17 : vector<16x1xf32>
    %19 = vector.broadcast %18 : vector<16x1xf32> to vector<16x32xf32>
    %20 = arith.mulf %15, %19 : vector<16x32xf32>
    %21 = vector.broadcast %1 : vector<1x32xf32> to vector<16x32xf32>
    %22 = arith.mulf %20, %21 : vector<16x32xf32>
    %23 = vector.broadcast %2 : vector<1x32xf32> to vector<16x32xf32>
    %24 = arith.addf %22, %23 : vector<16x32xf32>
    %c64 = arith.constant 64 : index
    %c0_8 = arith.constant 0 : index
    %25 = vector.load %arg3[%c64, %c0_8] : memref<128x128xbf16, #tpu.memory_space<vmem>>, vector<32x96xbf16>
    %c7 = arith.constant 7 : index
    %c0_9 = arith.constant 0 : index
    %26 = vector.load %arg2[%c7, %c0_9] : memref<24x128xf32, #tpu.memory_space<vmem>>, vector<1x96xf32>
    %27 = arith.truncf %24 : vector<16x32xf32> to vector<16x32xbf16>
    %cst_10 = arith.constant dense<0.000000e+00> : vector<16x96xf32>
    %28 = tpu.matmul %27, %25, %cst_10 {dimension_numbers = #tpu.dot_dimension_numbers<[1], [0], [0], [1], [0, 0, 1, 1], [], []>} : vector<16x32xbf16>, vector<32x96xbf16>, vector<16x96xf32> -> vector<16x96xf32>
    %29 = vector.broadcast %26 : vector<1x96xf32> to vector<16x96xf32>
    %30 = arith.addf %28, %29 : vector<16x96xf32>
    %c8 = arith.constant 8 : index
    %c0_11 = arith.constant 0 : index
    %31 = vector.load %arg2[%c8, %c0_11] : memref<24x128xf32, #tpu.memory_space<vmem>>, vector<16x16xf32>
    %32 = vector.extract_strided_slice %30 {offsets = [0, 0], sizes = [16, 8], strides = [1, 1]} : vector<16x96xf32> to vector<16x8xf32>
    %33 = vector.extract_strided_slice %30 {offsets = [0, 32], sizes = [16, 8], strides = [1, 1]} : vector<16x96xf32> to vector<16x8xf32>
    %34 = vector.extract_strided_slice %30 {offsets = [0, 64], sizes = [16, 8], strides = [1, 1]} : vector<16x96xf32> to vector<16x8xf32>
    %35 = arith.truncf %32 : vector<16x8xf32> to vector<16x8xbf16>
    %36 = arith.truncf %33 : vector<16x8xf32> to vector<16x8xbf16>
    %cst_12 = arith.constant dense<0.000000e+00> : vector<16x16xf32>
    %37 = tpu.matmul %35, %36, %cst_12 {dimension_numbers = #tpu.dot_dimension_numbers<[1], [1], [0], [0], [0, 0, 1, 0], [], []>} : vector<16x8xbf16>, vector<16x8xbf16>, vector<16x16xf32> -> vector<16x16xf32>
    %38 = arith.addf %37, %31 : vector<16x16xf32>
    %cst_13 = arith.constant dense<0xFF800000> : vector<16xf32>
    %39 = vector.multi_reduction <maximumf>, %38, %cst_13 [1] : vector<16x16xf32> to vector<16xf32>
    %40 = vector.shape_cast %39 : vector<16xf32> to vector<16x1xf32>
    %41 = vector.broadcast %40 : vector<16x1xf32> to vector<16x16xf32>
    %42 = arith.subf %38, %41 : vector<16x16xf32>
    %43 = math.exp %42 : vector<16x16xf32>
    %cst_14 = arith.constant dense<0.000000e+00> : vector<16xf32>
    %44 = vector.multi_reduction <add>, %43, %cst_14 [1] : vector<16x16xf32> to vector<16xf32>
    %45 = vector.shape_cast %44 : vector<16xf32> to vector<16x1xf32>
    %46 = tpu.reciprocal %45 {approx = true} : vector<16x1xf32> -> vector<16x1xf32>
    %47 = vector.broadcast %46 : vector<16x1xf32> to vector<16x16xf32>
    %48 = arith.mulf %43, %47 : vector<16x16xf32>
    %49 = arith.truncf %48 : vector<16x16xf32> to vector<16x16xbf16>
    %50 = arith.truncf %34 : vector<16x8xf32> to vector<16x8xbf16>
    %cst_15 = arith.constant dense<0.000000e+00> : vector<16x8xf32>
    %51 = tpu.matmul %49, %50, %cst_15 {dimension_numbers = #tpu.dot_dimension_numbers<[1], [0], [0], [1], [0, 0, 1, 1], [], []>} : vector<16x16xbf16>, vector<16x8xbf16>, vector<16x8xf32> -> vector<16x8xf32>
    %52 = vector.extract_strided_slice %30 {offsets = [0, 8], sizes = [16, 8], strides = [1, 1]} : vector<16x96xf32> to vector<16x8xf32>
    %53 = vector.extract_strided_slice %30 {offsets = [0, 40], sizes = [16, 8], strides = [1, 1]} : vector<16x96xf32> to vector<16x8xf32>
    %54 = vector.extract_strided_slice %30 {offsets = [0, 72], sizes = [16, 8], strides = [1, 1]} : vector<16x96xf32> to vector<16x8xf32>
    %55 = arith.truncf %52 : vector<16x8xf32> to vector<16x8xbf16>
    %56 = arith.truncf %53 : vector<16x8xf32> to vector<16x8xbf16>
    %cst_16 = arith.constant dense<0.000000e+00> : vector<16x16xf32>
    %57 = tpu.matmul %55, %56, %cst_16 {dimension_numbers = #tpu.dot_dimension_numbers<[1], [1], [0], [0], [0, 0, 1, 0], [], []>} : vector<16x8xbf16>, vector<16x8xbf16>, vector<16x16xf32> -> vector<16x16xf32>
    %58 = arith.addf %57, %31 : vector<16x16xf32>
    %cst_17 = arith.constant dense<0xFF800000> : vector<16xf32>
    %59 = vector.multi_reduction <maximumf>, %58, %cst_17 [1] : vector<16x16xf32> to vector<16xf32>
    %60 = vector.shape_cast %59 : vector<16xf32> to vector<16x1xf32>
    %61 = vector.broadcast %60 : vector<16x1xf32> to vector<16x16xf32>
    %62 = arith.subf %58, %61 : vector<16x16xf32>
    %63 = math.exp %62 : vector<16x16xf32>
    %cst_18 = arith.constant dense<0.000000e+00> : vector<16xf32>
    %64 = vector.multi_reduction <add>, %63, %cst_18 [1] : vector<16x16xf32> to vector<16xf32>
    %65 = vector.shape_cast %64 : vector<16xf32> to vector<16x1xf32>
    %66 = tpu.reciprocal %65 {approx = true} : vector<16x1xf32> -> vector<16x1xf32>
    %67 = vector.broadcast %66 : vector<16x1xf32> to vector<16x16xf32>
    %68 = arith.mulf %63, %67 : vector<16x16xf32>
    %69 = arith.truncf %68 : vector<16x16xf32> to vector<16x16xbf16>
    %70 = arith.truncf %54 : vector<16x8xf32> to vector<16x8xbf16>
    %cst_19 = arith.constant dense<0.000000e+00> : vector<16x8xf32>
    %71 = tpu.matmul %69, %70, %cst_19 {dimension_numbers = #tpu.dot_dimension_numbers<[1], [0], [0], [1], [0, 0, 1, 1], [], []>} : vector<16x16xbf16>, vector<16x8xbf16>, vector<16x8xf32> -> vector<16x8xf32>
    %72 = vector.extract_strided_slice %30 {offsets = [0, 16], sizes = [16, 8], strides = [1, 1]} : vector<16x96xf32> to vector<16x8xf32>
    %73 = vector.extract_strided_slice %30 {offsets = [0, 48], sizes = [16, 8], strides = [1, 1]} : vector<16x96xf32> to vector<16x8xf32>
    %74 = vector.extract_strided_slice %30 {offsets = [0, 80], sizes = [16, 8], strides = [1, 1]} : vector<16x96xf32> to vector<16x8xf32>
    %75 = arith.truncf %72 : vector<16x8xf32> to vector<16x8xbf16>
    %76 = arith.truncf %73 : vector<16x8xf32> to vector<16x8xbf16>
    %cst_20 = arith.constant dense<0.000000e+00> : vector<16x16xf32>
    %77 = tpu.matmul %75, %76, %cst_20 {dimension_numbers = #tpu.dot_dimension_numbers<[1], [1], [0], [0], [0, 0, 1, 0], [], []>} : vector<16x8xbf16>, vector<16x8xbf16>, vector<16x16xf32> -> vector<16x16xf32>
    %78 = arith.addf %77, %31 : vector<16x16xf32>
    %cst_21 = arith.constant dense<0xFF800000> : vector<16xf32>
    %79 = vector.multi_reduction <maximumf>, %78, %cst_21 [1] : vector<16x16xf32> to vector<16xf32>
    %80 = vector.shape_cast %79 : vector<16xf32> to vector<16x1xf32>
    %81 = vector.broadcast %80 : vector<16x1xf32> to vector<16x16xf32>
    %82 = arith.subf %78, %81 : vector<16x16xf32>
    %83 = math.exp %82 : vector<16x16xf32>
    %cst_22 = arith.constant dense<0.000000e+00> : vector<16xf32>
    %84 = vector.multi_reduction <add>, %83, %cst_22 [1] : vector<16x16xf32> to vector<16xf32>
    %85 = vector.shape_cast %84 : vector<16xf32> to vector<16x1xf32>
    %86 = tpu.reciprocal %85 {approx = true} : vector<16x1xf32> -> vector<16x1xf32>
    %87 = vector.broadcast %86 : vector<16x1xf32> to vector<16x16xf32>
    %88 = arith.mulf %83, %87 : vector<16x16xf32>
    %89 = arith.truncf %88 : vector<16x16xf32> to vector<16x16xbf16>
    %90 = arith.truncf %74 : vector<16x8xf32> to vector<16x8xbf16>
    %cst_23 = arith.constant dense<0.000000e+00> : vector<16x8xf32>
    %91 = tpu.matmul %89, %90, %cst_23 {dimension_numbers = #tpu.dot_dimension_numbers<[1], [0], [0], [1], [0, 0, 1, 1], [], []>} : vector<16x16xbf16>, vector<16x8xbf16>, vector<16x8xf32> -> vector<16x8xf32>
    %92 = vector.extract_strided_slice %30 {offsets = [0, 24], sizes = [16, 8], strides = [1, 1]} : vector<16x96xf32> to vector<16x8xf32>
    %93 = vector.extract_strided_slice %30 {offsets = [0, 56], sizes = [16, 8], strides = [1, 1]} : vector<16x96xf32> to vector<16x8xf32>
    %94 = vector.extract_strided_slice %30 {offsets = [0, 88], sizes = [16, 8], strides = [1, 1]} : vector<16x96xf32> to vector<16x8xf32>
    %95 = arith.truncf %92 : vector<16x8xf32> to vector<16x8xbf16>
    %96 = arith.truncf %93 : vector<16x8xf32> to vector<16x8xbf16>
    %cst_24 = arith.constant dense<0.000000e+00> : vector<16x16xf32>
    %97 = tpu.matmul %95, %96, %cst_24 {dimension_numbers = #tpu.dot_dimension_numbers<[1], [1], [0], [0], [0, 0, 1, 0], [], []>} : vector<16x8xbf16>, vector<16x8xbf16>, vector<16x16xf32> -> vector<16x16xf32>
    %98 = arith.addf %97, %31 : vector<16x16xf32>
    %cst_25 = arith.constant dense<0xFF800000> : vector<16xf32>
    %99 = vector.multi_reduction <maximumf>, %98, %cst_25 [1] : vector<16x16xf32> to vector<16xf32>
    %100 = vector.shape_cast %99 : vector<16xf32> to vector<16x1xf32>
    %101 = vector.broadcast %100 : vector<16x1xf32> to vector<16x16xf32>
    %102 = arith.subf %98, %101 : vector<16x16xf32>
    %103 = math.exp %102 : vector<16x16xf32>
    %cst_26 = arith.constant dense<0.000000e+00> : vector<16xf32>
    %104 = vector.multi_reduction <add>, %103, %cst_26 [1] : vector<16x16xf32> to vector<16xf32>
    %105 = vector.shape_cast %104 : vector<16xf32> to vector<16x1xf32>
    %106 = tpu.reciprocal %105 {approx = true} : vector<16x1xf32> -> vector<16x1xf32>
    %107 = vector.broadcast %106 : vector<16x1xf32> to vector<16x16xf32>
    %108 = arith.mulf %103, %107 : vector<16x16xf32>
    %109 = arith.truncf %108 : vector<16x16xf32> to vector<16x16xbf16>
    %110 = arith.truncf %94 : vector<16x8xf32> to vector<16x8xbf16>
    %cst_27 = arith.constant dense<0.000000e+00> : vector<16x8xf32>
    %111 = tpu.matmul %109, %110, %cst_27 {dimension_numbers = #tpu.dot_dimension_numbers<[1], [0], [0], [1], [0, 0, 1, 1], [], []>} : vector<16x16xbf16>, vector<16x8xbf16>, vector<16x8xf32> -> vector<16x8xf32>
    %112 = tpu.concatenate %51, %71, %91, %111 in 1 : vector<16x8xf32>, vector<16x8xf32>, vector<16x8xf32>, vector<16x8xf32> -> vector<16x32xf32>
    %c96 = arith.constant 96 : index
    %c0_28 = arith.constant 0 : index
    %113 = vector.load %arg3[%c96, %c0_28] : memref<128x128xbf16, #tpu.memory_space<vmem>>, vector<32x32xbf16>
    %c4 = arith.constant 4 : index
    %c0_29 = arith.constant 0 : index
    %114 = vector.load %arg2[%c4, %c0_29] : memref<24x128xf32, #tpu.memory_space<vmem>>, vector<1x32xf32>
    %115 = arith.truncf %112 : vector<16x32xf32> to vector<16x32xbf16>
    %cst_30 = arith.constant dense<0.000000e+00> : vector<16x32xf32>
    %116 = tpu.matmul %115, %113, %cst_30 {dimension_numbers = #tpu.dot_dimension_numbers<[1], [0], [0], [1], [0, 0, 1, 1], [], []>} : vector<16x32xbf16>, vector<32x32xbf16>, vector<16x32xf32> -> vector<16x32xf32>
    %117 = vector.broadcast %114 : vector<1x32xf32> to vector<16x32xf32>
    %118 = arith.addf %116, %117 : vector<16x32xf32>
    %119 = arith.addf %0, %118 : vector<16x32xf32>
    %c2 = arith.constant 2 : index
    %c0_31 = arith.constant 0 : index
    %120 = vector.load %arg2[%c2, %c0_31] : memref<24x128xf32, #tpu.memory_space<vmem>>, vector<1x32xf32>
    %c3 = arith.constant 3 : index
    %c0_32 = arith.constant 0 : index
    %121 = vector.load %arg2[%c3, %c0_32] : memref<24x128xf32, #tpu.memory_space<vmem>>, vector<1x32xf32>
    %cst_33 = arith.constant dense<0.000000e+00> : vector<16xf32>
    %122 = vector.multi_reduction <add>, %119, %cst_33 [1] : vector<16x32xf32> to vector<16xf32>
    %123 = vector.shape_cast %122 : vector<16xf32> to vector<16x1xf32>
    %cst_34 = arith.constant 3.200000e+01 : f32
    %124 = vector.broadcast %cst_34 : f32 to vector<16x1xf32>
    %125 = arith.divf %123, %124 : vector<16x1xf32>
    %126 = vector.broadcast %125 : vector<16x1xf32> to vector<16x32xf32>
    %127 = arith.subf %119, %126 : vector<16x32xf32>
    %128 = arith.mulf %127, %127 : vector<16x32xf32>
    %cst_35 = arith.constant dense<0.000000e+00> : vector<16xf32>
    %129 = vector.multi_reduction <add>, %128, %cst_35 [1] : vector<16x32xf32> to vector<16xf32>
    %130 = vector.shape_cast %129 : vector<16xf32> to vector<16x1xf32>
    %cst_36 = arith.constant 3.200000e+01 : f32
    %131 = vector.broadcast %cst_36 : f32 to vector<16x1xf32>
    %132 = arith.divf %130, %131 : vector<16x1xf32>
    %133 = vector.broadcast %125 : vector<16x1xf32> to vector<16x32xf32>
    %134 = arith.subf %119, %133 : vector<16x32xf32>
    %cst_37 = arith.constant 9.99999974E-6 : f32
    %135 = vector.broadcast %cst_37 : f32 to vector<16x1xf32>
    %136 = arith.addf %132, %135 : vector<16x1xf32>
    %137 = math.rsqrt %136 : vector<16x1xf32>
    %138 = vector.broadcast %137 : vector<16x1xf32> to vector<16x32xf32>
    %139 = arith.mulf %134, %138 : vector<16x32xf32>
    %140 = vector.broadcast %120 : vector<1x32xf32> to vector<16x32xf32>
    %141 = arith.mulf %139, %140 : vector<16x32xf32>
    %142 = vector.broadcast %121 : vector<1x32xf32> to vector<16x32xf32>
    %143 = arith.addf %141, %142 : vector<16x32xf32>
    %c0_38 = arith.constant 0 : index
    %c0_39 = arith.constant 0 : index
    %144 = vector.load %arg3[%c0_38, %c0_39] : memref<128x128xbf16, #tpu.memory_space<vmem>>, vector<32x128xbf16>
    %c6 = arith.constant 6 : index
    %c0_40 = arith.constant 0 : index
    %145 = vector.load %arg2[%c6, %c0_40] : memref<24x128xf32, #tpu.memory_space<vmem>>, vector<1x128xf32>
    %146 = arith.truncf %143 : vector<16x32xf32> to vector<16x32xbf16>
    %cst_41 = arith.constant dense<0.000000e+00> : vector<16x128xf32>
    %147 = tpu.matmul %146, %144, %cst_41 {dimension_numbers = #tpu.dot_dimension_numbers<[1], [0], [0], [1], [0, 0, 1, 1], [], []>} : vector<16x32xbf16>, vector<32x128xbf16>, vector<16x128xf32> -> vector<16x128xf32>
    %148 = vector.broadcast %145 : vector<1x128xf32> to vector<16x128xf32>
    %149 = arith.addf %147, %148 : vector<16x128xf32>
    %cst_42 = arith.constant 5.000000e-01 : f32
    %150 = vector.broadcast %cst_42 : f32 to vector<16x128xf32>
    %151 = arith.mulf %150, %149 : vector<16x128xf32>
    %cst_43 = arith.constant 4.471500e-02 : f32
    %152 = vector.broadcast %cst_43 : f32 to vector<16x128xf32>
    %153 = arith.mulf %152, %149 : vector<16x128xf32>
    %154 = arith.mulf %153, %149 : vector<16x128xf32>
    %155 = arith.mulf %154, %149 : vector<16x128xf32>
    %156 = arith.addf %149, %155 : vector<16x128xf32>
    %cst_44 = arith.constant 0.797884583 : f32
    %157 = vector.broadcast %cst_44 : f32 to vector<16x128xf32>
    %158 = arith.mulf %157, %156 : vector<16x128xf32>
    %159 = math.tanh %158 : vector<16x128xf32>
    %cst_45 = arith.constant 1.000000e+00 : f32
    %160 = vector.broadcast %cst_45 : f32 to vector<16x128xf32>
    %161 = arith.addf %160, %159 : vector<16x128xf32>
    %162 = arith.mulf %151, %161 : vector<16x128xf32>
    %163 = arith.truncf %162 : vector<16x128xf32> to vector<16x128xbf16>
    %c5 = arith.constant 5 : index
    %c0_46 = arith.constant 0 : index
    %164 = vector.load %arg2[%c5, %c0_46] : memref<24x128xf32, #tpu.memory_space<vmem>>, vector<1x32xf32>
    %165 = vector.extract_strided_slice %163 {offsets = [0, 0], sizes = [16, 32], strides = [1, 1]} : vector<16x128xbf16> to vector<16x32xbf16>
    %c32 = arith.constant 32 : index
    %c0_47 = arith.constant 0 : index
    %166 = vector.load %arg3[%c32, %c0_47] : memref<128x128xbf16, #tpu.memory_space<vmem>>, vector<32x32xbf16>
    %cst_48 = arith.constant dense<0.000000e+00> : vector<16x32xf32>
    %167 = tpu.matmul %165, %166, %cst_48 {dimension_numbers = #tpu.dot_dimension_numbers<[1], [0], [0], [1], [0, 0, 1, 1], [], []>} : vector<16x32xbf16>, vector<32x32xbf16>, vector<16x32xf32> -> vector<16x32xf32>
    %168 = vector.broadcast %164 : vector<1x32xf32> to vector<16x32xf32>
    %169 = arith.addf %168, %167 : vector<16x32xf32>
    %170 = vector.extract_strided_slice %163 {offsets = [0, 32], sizes = [16, 32], strides = [1, 1]} : vector<16x128xbf16> to vector<16x32xbf16>
    %c32_49 = arith.constant 32 : index
    %c32_50 = arith.constant 32 : index
    %171 = vector.load %arg3[%c32_49, %c32_50] : memref<128x128xbf16, #tpu.memory_space<vmem>>, vector<32x32xbf16>
    %cst_51 = arith.constant dense<0.000000e+00> : vector<16x32xf32>
    %172 = tpu.matmul %170, %171, %cst_51 {dimension_numbers = #tpu.dot_dimension_numbers<[1], [0], [0], [1], [0, 0, 1, 1], [], []>} : vector<16x32xbf16>, vector<32x32xbf16>, vector<16x32xf32> -> vector<16x32xf32>
    %173 = arith.addf %169, %172 : vector<16x32xf32>
    %174 = vector.extract_strided_slice %163 {offsets = [0, 64], sizes = [16, 32], strides = [1, 1]} : vector<16x128xbf16> to vector<16x32xbf16>
    %c32_52 = arith.constant 32 : index
    %c64_53 = arith.constant 64 : index
    %175 = vector.load %arg3[%c32_52, %c64_53] : memref<128x128xbf16, #tpu.memory_space<vmem>>, vector<32x32xbf16>
    %cst_54 = arith.constant dense<0.000000e+00> : vector<16x32xf32>
    %176 = tpu.matmul %174, %175, %cst_54 {dimension_numbers = #tpu.dot_dimension_numbers<[1], [0], [0], [1], [0, 0, 1, 1], [], []>} : vector<16x32xbf16>, vector<32x32xbf16>, vector<16x32xf32> -> vector<16x32xf32>
    %177 = arith.addf %173, %176 : vector<16x32xf32>
    %178 = vector.extract_strided_slice %163 {offsets = [0, 96], sizes = [16, 32], strides = [1, 1]} : vector<16x128xbf16> to vector<16x32xbf16>
    %c32_55 = arith.constant 32 : index
    %c96_56 = arith.constant 96 : index
    %179 = vector.load %arg3[%c32_55, %c96_56] : memref<128x128xbf16, #tpu.memory_space<vmem>>, vector<32x32xbf16>
    %cst_57 = arith.constant dense<0.000000e+00> : vector<16x32xf32>
    %180 = tpu.matmul %178, %179, %cst_57 {dimension_numbers = #tpu.dot_dimension_numbers<[1], [0], [0], [1], [0, 0, 1, 1], [], []>} : vector<16x32xbf16>, vector<32x32xbf16>, vector<16x32xf32> -> vector<16x32xf32>
    %181 = arith.addf %177, %180 : vector<16x32xf32>
    %182 = arith.addf %119, %181 : vector<16x32xf32>
    %c0_58 = arith.constant 0 : index
    %c0_59 = arith.constant 0 : index
    %183 = vector.load %arg4[%c0_58, %c0_59] : memref<16x32xf32, #tpu.memory_space<vmem>>, vector<16x32xf32>
    tpu.vector_store %arg4[%c0_58, %c0_59], %182 {strides = array<i32>} : memref<16x32xf32, #tpu.memory_space<vmem>>, vector<16x32xf32>,
    return
  }
  func.func @transform_0(%arg0: i32) -> (i32, i32) {
    %c0_i32 = arith.constant 0 : i32
    %c0_i32_0 = arith.constant 0 : i32
    %c0_i32_1 = arith.constant 0 : i32
    return %c0_i32, %c0_i32_0 : i32, i32
  }
  func.func @transform_1(%arg0: i32) -> (i32, i32) {
    %c0_i32 = arith.constant 0 : i32
    %c0_i32_0 = arith.constant 0 : i32
    %c0_i32_1 = arith.constant 0 : i32
    return %c0_i32, %c0_i32_0 : i32, i32
  }
  func.func @transform_2(%arg0: i32) -> (i32, i32) {
    %c0_i32 = arith.constant 0 : i32
    %c0_i32_0 = arith.constant 0 : i32
    %c0_i32_1 = arith.constant 0 : i32
    return %c0_i32, %c0_i32_0 : i32, i32
  }
  func.func @transform_3(%arg0: i32) -> (i32, i32) {
    %c0_i32 = arith.constant 0 : i32
    %c0_i32_0 = arith.constant 0 : i32
    %c0_i32_1 = arith.constant 0 : i32
    return %c0_i32, %c0_i32_0 : i32, i32
  }
}

</mosaic_0001>

<bundles_post_ra>
// kernel: transformer_block.1
= control target key start
LH: loop header
LB: loop body
LE: loop exit
PB: predicated region body
PF: predicated region fallthrough
CT: control target
= control target key end

     0   :  { %8 = vsyncpa [#allocation3], 0  ;;  %s1187_s0 = inlined_call_operand.hbm [shape: f32[16,32], index: 0, kind: input, shape index: {}]   ;;  %s1188_s1 = inlined_call_operand.hbm [shape: f32[24,128], index: 1, kind: input, shape index: {}]   ;;  %s1189_s2 = inlined_call_operand.hbm [shape: bf16[128,128], index: 2, kind: input, shape index: {}]   ;;  %s1190_s3 = inlined_call_operand.hbm [shape: f32[16,32], index: 3, kind: output, shape index: {}]  }
   0x1   :  { %9 = vsyncpa [#allocation6], 0 }
   0x2   :  { %10 = vsyncpa [#allocation4], 0  ;;  %s28_s14 = sshll.u32 %s1188_s1, 4  ;;  %s1005_s15 = smov [#allocation5]   ;;  %s29_s14 = int_to_ptr.hbm [resolvable:$true] %s28_s14 }
   0x3   :  { %s30_s16 = sshll.u32 %s1005_s15, 4  ;;  %s15_s19 = sshll.u32 %s1187_s0, 4  ;;  %s31_s16 = int_to_ptr.vmem [resolvable:$true] %s30_s16  ;;  %s16_s19 = int_to_ptr.hbm [resolvable:$true] %s15_s19 }
   0x4   :  { %s1006_s20 = smov 128   ;;  %s1007_s21 = smov 8  }
   0x5   :  { %36 = dma.hbm_to_vmem [thread:$0]  %s29_s14, 384, %s31_s16, [#allocation6], %s1006_s20, %s1006_s20, %s1007_s21  }
   0x6   :  { %s1008_s22 = smov [#allocation2]   ;;  %s41_s1 = sshll.u32 %s1189_s2, 4  ;;  %s42_s1 = int_to_ptr.hbm [resolvable:$true] %s41_s1 }
   0x7   :  { %s17_s23 = sshll.u32 %s1008_s22, 4  ;;  %s1009_s0 = smov [#allocation7]   ;;  %s18_s23 = int_to_ptr.vmem [resolvable:$true] %s17_s23 }
   0x8   :  { %23 = dma.hbm_to_vmem [thread:$0]  %s16_s19, 256, %s18_s23, [#allocation3], %s1006_s20, %s1006_s20, %s1007_s21  }
   0x9   :  { %s43_s26 = sshll.u32 %s1009_s0, 4  ;;  %s1010_s27 = smov 64   ;;  %s44_s26 = int_to_ptr.vmem [resolvable:$true] %s43_s26 }
   0xa   :  { %s1011_s28 = smov 4  }
   0xb   :  { %49 = dma.hbm_to_vmem [thread:$0]  %s42_s1, 1024, %s44_s26, [#allocation6], %s1010_s27, %s1010_s27, %s1011_s28  }
   0xc   :  { %999 = dma.done.wait [#allocation3], 256  }
   0xd   :  { %1000 = vsyncadd [#allocation3], 4294967040 }
   0xe   :  { %1001 = dma.done.wait [#allocation6], 1408  }
   0xf   :  { %1002 = vsyncadd [#allocation6], 4294965888  ;;  %vm67_vm0 = vcmask 261120   ;;  %v1064_v0 = vld [vmem:[#allocation2] sm:$0xff]  ;;  %v1068_v2 = vld [vmem:[#allocation2 + $0x8] sm:$0xff]  ;;  %v1012_v4 = vmov 32.0  }
  0x10   :  { %v68_v1 = vsel %vm67_vm0, %v1064_v0, 0.0  ;;  %v71_v3 = vsel %vm67_vm0, %v1068_v2, 0.0  ;;  %857 = vrcp.f32 %v1012_v4  ;;  %v805_v21 = vld [vmem:[#allocation7 + $0x28] sm:$0xff]  ;;  %v804_v23 = vld [vmem:[#allocation7 + $0x20] sm:$0xff]  ;;  %s1013_s2 = smov 72   ;;  %s1014_s29 = smov 120  }
  0x11   :  { %69 = vadd.xlane.f32.xlu0 %v68_v1  ;;  %153 = vmatpush.bf16.msra.mxu0 %v805_v21  ;;  %v849_v42 = vld [vmem:[#allocation5] ss:$0 sm:$0xff]  ;;  %v850_v47 = vld [vmem:[#allocation5 + $0x1] ss:$0 sm:$0xff]  ;;  %v851_v53 = vld [vmem:[#allocation5 + $0x7] ss:$0 sm:$0xff] }
  0x12   :  { %s1015_s30 = smov 96   ;;  %s1016_s4 = smov 88   ;;  %vm167_vm8 = vcmask 64512   ;;  %vm188_vm9 = vcmask 130048   ;;  %vm461_vm10 = vcmask 195584  }
  0x13   :  { %s1017_s5 = smov 104   ;;  %s1018_s6 = smov 80  }
  0x14   :  { %s1019_s7 = smov 112   ;;  %s1020_s8 = smov 56  }
  0x15   :  { %154 = vmatpush.bf16.msra.mxu0 %v804_v23  ;;  %s1021_s9 = smov 40   ;;  %s1022_s10 = smov 48  }
  0x16   :  { %v858_v5 = vpop.eup %857  ;;  %s1023_s11 = smov 24   ;;  %s1024_s12 = smov 16  }
  0x17   :  { %v75_v6 = vmul.f32 32.0, %v858_v5  ;;  %vm79_vm1 = vweird.f32 %v858_v5  ;;  %s1025_s13 = smov 32   ;;  %s1026_s14 = smov [#allocation8]  }
  0x18   :  { %s741_s15 = sshll.u32 %s1026_s14, 4  ;;  %s743_s18 = sshll.u32 %s1190_s3, 4  ;;  %s742_s15 = int_to_ptr.vmem [resolvable:$true] %s741_s15  ;;  %s744_s18 = int_to_ptr.hbm [resolvable:$true] %s743_s18 }
  0x19   :  { %72 = vadd.xlane.f32.xlu0 %v71_v3  ;;  %v76_v7 = vsub.f32 1.0, %v75_v6 }
  0x1b   :  { %v77_v8 = vmul.f32 %v858_v5, %v76_v7  ;;  %v161_v7 = vld [vmem:[#allocation5 + $0x8] sm:$0xff] }
  0x1d   :  { %v78_v9 = vadd.f32 %v858_v5, %v77_v8 }
  0x1f   :  { %v1072_v10 = vsel %vm79_vm1, %v858_v5, %v78_v9 }
  0x84   :  { %v70_v11 = vpop.xlane.xlu0 %69 }
  0x85   :  { %v81_v12 = vmul.f32 %v1072_v10, %v70_v11 }
  0x87   :  { %v83_v13 = vsub.f32 %v1064_v0, %v81_v12  ;;  %v162_v12 = vld [vmem:[#allocation5 + $0x10] sm:$0xff] }
  0x89   :  { %v85_v14 = vmul.f32 %v83_v13, %v83_v13 }
  0x8b   :  { %v87_v15 = vsel %vm67_vm0, %v85_v14, 0.0 }
  0x8c   :  { %88 = vadd.xlane.f32.xlu1 %v87_v15  ;;  %v73_v16 = vpop.xlane.xlu0 %72 }
  0x8d   :  { %v82_v17 = vmul.f32 %v1072_v10, %v73_v16 }
  0x8f   :  { %v84_v18 = vsub.f32 %v1068_v2, %v82_v17 }
  0x91   :  { %v86_v19 = vmul.f32 %v84_v18, %v84_v18 }
  0x93   :  { %v90_v20 = vsel %vm67_vm0, %v86_v19, 0.0 }
  0x94   :  { %91 = vadd.xlane.f32.xlu1 %v90_v20 }
  0xff   :  { %v89_v22 = vpop.xlane.xlu1 %88 }
 0x100   :  { %v93_v24 = vmul.f32 %v89_v22, %v1072_v10 }
 0x102   :  { %v95_v25 = vadd.f32 1e-05, %v93_v24 }
 0x104   :  { %859 = vrsqrt.f32 %v95_v25  ;;  %vm103_vm3 = vweird.f32 %v95_v25 }
 0x107   :  { %v92_v26 = vpop.xlane.xlu1 %91 }
 0x108   :  { %v94_v27 = vmul.f32 %v92_v26, %v1072_v10 }
 0x10a   :  { %v860_v28 = vpop.eup %859  ;;  %v96_v29 = vadd.f32 1e-05, %v94_v27 }
 0x10b   :  { %v98_v30 = vmul.f32 %v860_v28, %v95_v25  ;;  %vm104_vm2 = vweird.f32 %v860_v28 }
 0x10c   :  { %861 = vrsqrt.f32 %v96_v29  ;;  %vm105_vm4 = vmor %vm103_vm3, %vm104_vm2  ;;  %vm113_vm6 = vweird.f32 %v96_v29 }
 0x10d   :  { %v99_v31 = vmul.f32 %v860_v28, %v98_v30 }
 0x10f   :  { %v100_v32 = vmul.f32 0.5, %v99_v31 }
 0x111   :  { %v101_v33 = vsub.f32 1.5, %v100_v32 }
 0x112   :  { %v862_v34 = vpop.eup %861 }
 0x113   :  { %v102_v35 = vmul.f32 %v860_v28, %v101_v33  ;;  %v108_v36 = vmul.f32 %v862_v34, %v96_v29  ;;  %vm114_vm5 = vweird.f32 %v862_v34 }
 0x114   :  { %vm115_vm7 = vmor %vm113_vm6, %vm114_vm5 }
 0x115   :  { %v109_v37 = vmul.f32 %v862_v34, %v108_v36  ;;  %v106_v38 = vsel %vm105_vm4, %v860_v28, %v102_v35 }
 0x116   :  { %v117_v41 = vmul.f32 %v106_v38, %v83_v13 }
 0x117   :  { %v110_v39 = vmul.f32 0.5, %v109_v37 }
 0x118   :  { %v120_v46 = vmul.f32 %v849_v42, %v117_v41 }
 0x119   :  { %v111_v40 = vsub.f32 1.5, %v110_v39 }
 0x11a   :  { %v123_v49 = vadd.f32 %v850_v47, %v120_v46 }
 0x11b   :  { %v112_v43 = vmul.f32 %v862_v34, %v111_v40 }
 0x11d   :  { %v116_v44 = vsel %vm115_vm7, %v862_v34, %v112_v43 }
 0x11e   :  { %v118_v45 = vmul.f32 %v116_v44, %v84_v18 }
 0x120   :  { %v121_v48 = vmul.f32 %v849_v42, %v118_v45 }
 0x122   :  { %v124_v50 = vadd.f32 %v850_v47, %v121_v48 }
 0x124   :  { %v130_v51 = vpack.c.bf16 %v124_v50, %v123_v49 }
 0x126   :  { %765 = vmatmul.msk.bf16.vlgmr.msra.gmra.mxu0 %vm67_vm0, %v130_v51 }
 0x1a3   :  { %v156_v52 = vpop.f32.mrf.mxu0 }
 0x1a4   :  { %v157_v55 = vadd.f32 %v851_v53, %v156_v52 }
 0x1ab   :  { %v158_v54 = vpop.f32.mrf.mxu0 }
 0x1ac   :  { %v159_v56 = vadd.f32 %v851_v53, %v158_v54 }
 0x1ae   :  { %v1083_v57 = vpack.c.bf16 %v159_v56, %v157_v55 }
 0x1b0   :  { %368 = vrot.lane.b32.xlu1 %v1083_v57, %s1013_s2  ;;  %232 = vrot.lane.b32.xlu0 %v1083_v57, %s1014_s29 }
 0x1b1   :  { %165 = vrot.lane.b32.xlu2 %v1083_v57, %s1015_s30 }
 0x1b9   :  { %234 = vrot.lane.b32.xlu2 %v1083_v57, %s1016_s4 }
 0x1c1   :  { %366 = vrot.lane.b32.xlu2 %v1083_v57, %s1017_s5 }
 0x1c9   :  { %301 = vrot.lane.b32.xlu2 %v1083_v57, %s1018_s6 }
 0x1d1   :  { %299 = vrot.lane.b32.xlu2 %v1083_v57, %s1019_s7 }
 0x20b   :  { %v166_v58 = vpop.permute.xlu2 %165 }
 0x20c   :  { %v172_v59 = vsel %vm167_vm8, %v166_v58, 0 }
 0x20d   :  { %181 = vmatpush.bf16.xpose.msra.mxu1 %v172_v59 }
 0x213   :  { %v235_v60 = vpop.permute.xlu2 %234 }
 0x214   :  { %766 = vmatmul.msk.bf16.vlgmr.msra.gmra.mxu1 %vm167_vm8, %v1083_v57  ;;  %v240_v61 = vsel %vm167_vm8, %v235_v60, 0 }
 0x215   :  { %249 = vmatpush.bf16.xpose.msra.mxu3 %v240_v61 }
 0x21b   :  { %v367_v62 = vpop.permute.xlu2 %366 }
 0x222   :  { %v369_v63 = vpop.permute.xlu1 %368  ;;  %v233_v1 = vpop.permute.xlu0 %232 }
 0x223   :  { %v302_v3 = vpop.permute.xlu2 %301  ;;  %768 = vmatmul.msk.bf16.vlgmr.msra.gmra.mxu3 %vm167_vm8, %v233_v1  ;;  %v374_v4 = vsel %vm167_vm8, %v369_v63, 0 }
 0x224   :  { %v307_v5 = vsel %vm167_vm8, %v302_v3, 0  ;;  %383 = vmatpush.bf16.xpose.msrb.mxu3 %v374_v4 }
 0x225   :  { %316 = vmatpush.bf16.xpose.msrb.mxu0 %v307_v5 }
 0x22b   :  { %v300_v6 = vpop.permute.xlu2 %299 }
 0x22c   :  { %770 = vmatmul.msk.bf16.vlgmr.msrb.gmra.mxu0 %vm167_vm8, %v300_v6 }
 0x233   :  { %772 = vmatmul.msk.bf16.vlgmr.msrb.gmra.mxu3 %vm167_vm8, %v367_v62 }
 0x291   :  { %v183_v8 = vpop.f32.mrf.mxu1 }
 0x292   :  { %v184_v9 = vadd.f32 %v183_v8, %v161_v7 }
 0x294   :  { %v189_v11 = vsel %vm188_vm9, %v184_v9, -inf }
 0x295   :  { %190 = vmax.xlane.f32.xlu0 %v189_v11 }
 0x299   :  { %v185_v13 = vpop.f32.mrf.mxu1 }
 0x29a   :  { %v186_v14 = vadd.f32 %v185_v13, %v162_v12 }
 0x29c   :  { %v192_v15 = vsel %vm188_vm9, %v186_v14, -inf }
 0x29d   :  { %193 = vmax.xlane.f32.xlu2 %v192_v15 }
 0x2a6   :  { %v251_v16 = vpop.f32.mrf.mxu3 }
 0x2a7   :  { %v252_v17 = vadd.f32 %v251_v16, %v161_v7 }
 0x2a9   :  { %v318_v18 = vpop.f32.mrf.mxu0  ;;  %v256_v19 = vsel %vm188_vm9, %v252_v17, -inf }
 0x2aa   :  { %v319_v20 = vadd.f32 %v318_v18, %v161_v7  ;;  %257 = vmax.xlane.f32.xlu1 %v256_v19 }
 0x2ac   :  { %v323_v21 = vsel %vm188_vm9, %v319_v20, -inf }
 0x2ad   :  { %324 = vmax.xlane.f32.xlu0 %v323_v21 }
 0x2ae   :  { %v253_v22 = vpop.f32.mrf.mxu3 }
 0x2af   :  { %v254_v23 = vadd.f32 %v253_v22, %v162_v12 }
 0x2b1   :  { %v320_v24 = vpop.f32.mrf.mxu0  ;;  %v259_v27 = vsel %vm188_vm9, %v254_v23, -inf }
 0x2b2   :  { %v321_v25 = vadd.f32 %v320_v24, %v162_v12 }
 0x2b4   :  { %v326_v26 = vsel %vm188_vm9, %v321_v25, -inf }
 0x2b5   :  { %327 = vmax.xlane.f32.xlu2 %v326_v26  ;;  %260 = vmax.xlane.f32.xlu0 %v259_v27 }
 0x2b6   :  { %v385_v28 = vpop.f32.mrf.mxu3 }
 0x2b7   :  { %v386_v29 = vadd.f32 %v385_v28, %v161_v7 }
 0x2b9   :  { %v390_v30 = vsel %vm188_vm9, %v386_v29, -inf }
 0x2bd   :  { %391 = vmax.xlane.f32.xlu2 %v390_v30 }
 0x2be   :  { %v387_v31 = vpop.f32.mrf.mxu3 }
 0x2bf   :  { %v388_v32 = vadd.f32 %v387_v31, %v162_v12 }
 0x2c1   :  { %v393_v33 = vsel %vm188_vm9, %v388_v32, -inf }
 0x2c2   :  { %394 = vmax.xlane.f32.xlu1 %v393_v33 }
 0x2d5   :  { %212 = vrot.lane.b32.xlu2 %v1083_v57, %s1010_s27 }
 0x2db   :  { %279 = vrot.lane.b32.xlu1 %v1083_v57, %s1020_s8 }
 0x308   :  { %v191_v34 = vpop.xlane.xlu0 %190 }
 0x309   :  { %v195_v35 = vsub.f32 %v184_v9, %v191_v34 }
 0x30b   :  { %v197_v36 = vmul.f32 1.442695, %v195_v35 }
 0x30d   :  { %863 = vpow2.f32 %v197_v36 }
 0x310   :  { %v194_v37 = vpop.xlane.xlu2 %193 }
 0x311   :  { %v196_v38 = vsub.f32 %v186_v14, %v194_v37 }
 0x313   :  { %v1113_v39 = vpop.eup %863  ;;  %v199_v40 = vmul.f32 1.442695, %v196_v38 }
 0x314   :  { %v201_v41 = vsel %vm188_vm9, %v1113_v39, 0.0 }
 0x315   :  { %865 = vpow2.f32 %v199_v40  ;;  %202 = vadd.xlane.f32.xlu1 %v201_v41 }
 0x31b   :  { %v866_v42 = vpop.eup %865 }
 0x31c   :  { %v204_v43 = vsel %vm188_vm9, %v866_v42, 0.0 }
 0x31d   :  { %205 = vadd.xlane.f32.xlu0 %v204_v43  ;;  %v258_v44 = vpop.xlane.xlu1 %257 }
 0x31e   :  { %v262_v45 = vsub.f32 %v252_v17, %v258_v44 }
 0x320   :  { %v264_v46 = vmul.f32 1.442695, %v262_v45  ;;  %v325_v47 = vpop.xlane.xlu0 %324 }
 0x321   :  { %v329_v48 = vsub.f32 %v319_v20, %v325_v47 }
 0x322   :  { %867 = vpow2.f32 %v264_v46 }
 0x323   :  { %v331_v49 = vmul.f32 1.442695, %v329_v48 }
 0x325   :  { %869 = vpow2.f32 %v331_v49 }
 0x328   :  { %v868_v50 = vpop.eup %867  ;;  %v328_v51 = vpop.xlane.xlu2 %327 }
 0x329   :  { %v261_v52 = vpop.xlane.xlu0 %260  ;;  %v330_v53 = vsub.f32 %v321_v25, %v328_v51  ;;  %v268_v54 = vsel %vm188_vm9, %v868_v50, 0.0 }
 0x32a   :  { %269 = vadd.xlane.f32.xlu1 %v268_v54  ;;  %v263_v58 = vsub.f32 %v254_v23, %v261_v52 }
 0x32b   :  { %v1119_v55 = vpop.eup %869  ;;  %v333_v56 = vmul.f32 1.442695, %v330_v53 }
 0x32c   :  { %v335_v59 = vsel %vm188_vm9, %v1119_v55, 0.0  ;;  %v266_v60 = vmul.f32 1.442695, %v263_v58  ;;  %v806_v58 = vld [vmem:[#allocation7 + $0x30] sm:$0xff] }
 0x32d   :  { %336 = vadd.xlane.f32.xlu2 %v335_v59  ;;  %871 = vpow2.f32 %v333_v56  ;;  %v807_v56 = vld [vmem:[#allocation7 + $0x38] sm:$0xff] }
 0x32e   :  { %873 = vpow2.f32 %v266_v60  ;;  %492 = vmatpush.bf16.msra.mxu0 %v807_v56 }
 0x330   :  { %v392_v61 = vpop.xlane.xlu2 %391 }
 0x331   :  { %v396_v63 = vsub.f32 %v386_v29, %v392_v61 }
 0x332   :  { %493 = vmatpush.bf16.msra.mxu0 %v806_v58 }
 0x333   :  { %v1123_v62 = vpop.eup %871  ;;  %v398_v3 = vmul.f32 1.442695, %v396_v63 }
 0x334   :  { %v338_v1 = vsel %vm188_vm9, %v1123_v62, 0.0  ;;  %v874_v6 = vpop.eup %873 }
 0x335   :  { %339 = vadd.xlane.f32.xlu0 %v338_v1  ;;  %v395_v5 = vpop.xlane.xlu1 %394  ;;  %875 = vpow2.f32 %v398_v3  ;;  %v271_v8 = vsel %vm188_vm9, %v874_v6, 0.0 }
 0x336   :  { %v397_v7 = vsub.f32 %v388_v32, %v395_v5 }
 0x338   :  { %v213_v4 = vpop.permute.xlu2 %212  ;;  %v400_v9 = vmul.f32 1.442695, %v397_v7 }
 0x339   :  { %225 = vmatpush.bf16.msra.mxu2 %v213_v4 }
 0x33a   :  { %877 = vpow2.f32 %v400_v9 }
 0x33b   :  { %v876_v11 = vpop.eup %875 }
 0x33c   :  { %v402_v12 = vsel %vm188_vm9, %v876_v11, 0.0 }
 0x33d   :  { %272 = vadd.xlane.f32.xlu0 %v271_v8 }
 0x340   :  { %v878_v13 = vpop.eup %877 }
 0x341   :  { %v405_v14 = vsel %vm188_vm9, %v878_v13, 0.0 }
 0x343   :  { %413 = vrot.lane.b32.xlu1 %v1083_v57, %s1021_s9 }
 0x345   :  { %403 = vadd.xlane.f32.xlu0 %v402_v12 }
 0x34d   :  { %v280_v15 = vpop.permute.xlu1 %279  ;;  %406 = vadd.xlane.f32.xlu0 %v405_v14  ;;  %v852_v14 = vld [vmem:[#allocation5 + $0x4] ss:$0 sm:$0xff] }
 0x34e   :  { %292 = vmatpush.bf16.msrb.mxu2 %v280_v15 }
 0x361   :  { %346 = vrot.lane.b32.xlu0 %v1083_v57, %s1022_s10 }
 0x388   :  { %v203_v16 = vpop.xlane.xlu1 %202 }
 0x389   :  { %879 = vrcp.f32 %v203_v16 }
 0x38f   :  { %v880_v18 = vpop.eup %879 }
 0x390   :  { %v206_v17 = vpop.xlane.xlu0 %205  ;;  %v209_v20 = vmul.f32 %v880_v18, %v1113_v39 }
 0x391   :  { %881 = vrcp.f32 %v206_v17 }
 0x397   :  { %v882_v19 = vpop.eup %881 }
 0x398   :  { %v210_v21 = vmul.f32 %v882_v19, %v866_v42 }
 0x39a   :  { %v211_v22 = vpack.c.bf16 %v210_v21, %v209_v20 }
 0x39c   :  { %767 = vmatmul.msk.bf16.vlgmr.msra.gmra.mxu2 %vm188_vm9, %v211_v22 }
 0x39d   :  { %v270_v24 = vpop.xlane.xlu1 %269 }
 0x39e   :  { %883 = vrcp.f32 %v270_v24 }
 0x3a0   :  { %v337_v35 = vpop.xlane.xlu2 %336 }
 0x3a4   :  { %v884_v27 = vpop.eup %883 }
 0x3a5   :  { %v276_v28 = vmul.f32 %v884_v27, %v868_v50 }
 0x3a8   :  { %v340_v23 = vpop.xlane.xlu0 %339 }
 0x3b0   :  { %v273_v25 = vpop.xlane.xlu0 %272 }
 0x3b1   :  { %885 = vrcp.f32 %v273_v25 }
 0x3b5   :  { %v414_v26 = vpop.permute.xlu1 %413 }
 0x3b6   :  { %426 = vmatpush.bf16.msra.mxu2 %v414_v26 }
 0x3b7   :  { %v886_v57 = vpop.eup %885 }
 0x3b8   :  { %v277_v29 = vmul.f32 %v886_v57, %v874_v6  ;;  %v404_v30 = vpop.xlane.xlu0 %403 }
 0x3b9   :  { %887 = vrcp.f32 %v404_v30  ;;  %v809_v30 = vld [vmem:[#allocation7 + $0x8] sm:$0xff] }
 0x3ba   :  { %v278_v31 = vpack.c.bf16 %v277_v29, %v276_v28 }
 0x3bc   :  { %769 = vmatmul.msk.bf16.vlgmr.msrb.gmra.mxu2 %vm188_vm9, %v278_v31 }
 0x3bf   :  { %v888_v33 = vpop.eup %887 }
 0x3c0   :  { %v407_v32 = vpop.xlane.xlu0 %406  ;;  %v410_v36 = vmul.f32 %v888_v33, %v876_v11  ;;  %v808_v33 = vld [vmem:[#allocation7] sm:$0xff] }
 0x3c1   :  { %889 = vrcp.f32 %v407_v32 }
 0x3c2   :  { %891 = vrcp.f32 %v340_v23 }
 0x3c3   :  { %893 = vrcp.f32 %v337_v35 }
 0x3c7   :  { %v890_v34 = vpop.eup %889 }
 0x3c8   :  { %v411_v37 = vmul.f32 %v890_v34, %v878_v13  ;;  %v892_v39 = vpop.eup %891 }
 0x3c9   :  { %v894_v40 = vpop.eup %893  ;;  %v344_v41 = vmul.f32 %v892_v39, %v1123_v62 }
 0x3ca   :  { %v412_v38 = vpack.c.bf16 %v411_v37, %v410_v36  ;;  %v343_v42 = vmul.f32 %v894_v40, %v1119_v55 }
 0x3cc   :  { %773 = vmatmul.msk.bf16.vlgmr.msra.gmra.mxu2 %vm188_vm9, %v412_v38  ;;  %v345_v44 = vpack.c.bf16 %v344_v41, %v343_v42 }
 0x3d3   :  { %v347_v43 = vpop.permute.xlu0 %346 }
 0x3d4   :  { %359 = vmatpush.bf16.msrb.mxu1 %v347_v43 }
 0x3d7   :  { %771 = vmatmul.msk.bf16.vlgmr.msrb.gmra.mxu1 %vm188_vm9, %v345_v44 }
 0x3d8   :  { %582 = vmatpush.bf16.msra.mxu1 %v809_v30 }
 0x3dc   :  { %583 = vmatpush.bf16.msra.mxu1 %v808_v33 }
 0x41f   :  { %v227_v45 = vpop.f32.mrf.mxu2 }
 0x427   :  { %v229_v46 = vpop.f32.mrf.mxu2 }
 0x43f   :  { %v294_v47 = vpop.f32.mrf.mxu2 }
 0x447   :  { %v296_v48 = vpop.f32.mrf.mxu2 }
 0x448   :  { %v834_v49 = vpack.i.bf16 %v296_v48, %v294_v47 }
 0x44a   :  { %835 = vrot.lane.b32.xlu1 %v834_v49, %s1007_s21 }
 0x44f   :  { %v428_v50 = vpop.f32.mrf.mxu2 }
 0x454   :  { %v361_v51 = vpop.f32.mrf.mxu1 }
 0x457   :  { %v430_v52 = vpop.f32.mrf.mxu2 }
 0x458   :  { %v844_v53 = vpack.i.bf16 %v430_v52, %v428_v50  ;;  %v853_v50 = vld [vmem:[#allocation5 + $0x2] ss:$0 sm:$0xff] }
 0x45a   :  { %845 = vrot.lane.b32.xlu0 %v844_v53, %s1023_s11  ;;  %v854_v53 = vld [vmem:[#allocation5 + $0x3] ss:$0 sm:$0xff] }
 0x45c   :  { %v363_v54 = vpop.f32.mrf.mxu1 }
 0x45d   :  { %v839_v55 = vpack.i.bf16 %v363_v54, %v361_v51 }
 0x45f   :  { %840 = vrot.lane.b32.xlu1 %v839_v55, %s1024_s12 }
 0x4bc   :  { %v836_v59 = vpop.permute.xlu1 %835 }
 0x4bd   :  { %v838_v60 = vunpack.i.h.bf16 %v836_v59  ;;  %v837_v61 = vunpack.i.l.bf16 %v836_v59 }
 0x4bf   :  { %v458_v4 = vsel %vm167_vm8, %v229_v46, %v838_v60  ;;  %v457_v5 = vsel %vm167_vm8, %v227_v45, %v837_v61  ;;  %v810_v61 = vld [vmem:[#allocation7 + $0x10] sm:$0xff] }
 0x4cc   :  { %v846_v62 = vpop.permute.xlu0 %845 }
 0x4cd   :  { %v848_v6 = vunpack.i.h.bf16 %v846_v62  ;;  %v847_v7 = vunpack.i.l.bf16 %v846_v62  ;;  %v811_v62 = vld [vmem:[#allocation7 + $0x18] sm:$0xff] }
 0x4ce   :  { %641 = vmatpush.bf16.msra.mxu3 %v811_v62 }
 0x4d1   :  { %v841_v63 = vpop.permute.xlu1 %840 }
 0x4d2   :  { %v843_v1 = vunpack.i.h.bf16 %v841_v63  ;;  %v842_v3 = vunpack.i.l.bf16 %v841_v63  ;;  %642 = vmatpush.bf16.msra.mxu3 %v810_v61  ;;  %v855_v63 = vld [vmem:[#allocation5 + $0x6] ss:$0 sm:$0xff] }
 0x4d4   :  { %v460_v8 = vsel %vm188_vm9, %v458_v4, %v843_v1  ;;  %v459_v9 = vsel %vm188_vm9, %v457_v5, %v842_v3 }
 0x4d5   :  { %v463_v11 = vsel %vm461_vm10, %v460_v8, %v848_v6  ;;  %v462_v12 = vsel %vm461_vm10, %v459_v9, %v847_v7 }
 0x4d6   :  { %v469_v13 = vpack.c.bf16 %v463_v11, %v462_v12 }
 0x4d8   :  { %782 = vmatmul.msk.bf16.vlgmr.msra.gmra.mxu0 %vm67_vm0, %v469_v13 }
 0x555   :  { %v495_v15 = vpop.f32.mrf.mxu0 }
 0x556   :  { %v496_v16 = vadd.f32 %v852_v14, %v495_v15 }
 0x558   :  { %v1146_v17 = vadd.f32 %v496_v16, %v1064_v0 }
 0x55a   :  { %v504_v18 = vsel %vm67_vm0, %v1146_v17, 0.0 }
 0x55b   :  { %505 = vadd.xlane.f32.xlu1 %v504_v18 }
 0x55d   :  { %v497_v19 = vpop.f32.mrf.mxu0 }
 0x55e   :  { %v498_v20 = vadd.f32 %v852_v14, %v497_v19 }
 0x560   :  { %v1151_v21 = vadd.f32 %v498_v20, %v1068_v2 }
 0x562   :  { %v507_v22 = vsel %vm67_vm0, %v1151_v21, 0.0 }
 0x563   :  { %508 = vadd.xlane.f32.xlu0 %v507_v22 }
 0x574   :  { %654 = vrot.lane.b32.xlu1 %v810_v61, %s1015_s30 }
 0x577   :  { %683 = vrot.lane.b32.xlu0 %v811_v62, %s1010_s27 }
 0x57c   :  { %708 = vrot.lane.b32.xlu1 %v810_v61, %s1025_s13 }
 0x5ce   :  { %v506_v23 = vpop.xlane.xlu1 %505 }
 0x5cf   :  { %v510_v24 = vmul.f32 %v506_v23, %v1072_v10 }
 0x5d1   :  { %v512_v25 = vsub.f32 %v1146_v17, %v510_v24 }
 0x5d3   :  { %v514_v0 = vmul.f32 %v512_v25, %v512_v25 }
 0x5d5   :  { %v516_v26 = vsel %vm67_vm0, %v514_v0, 0.0 }
 0x5d6   :  { %v509_v27 = vpop.xlane.xlu0 %508  ;;  %517 = vadd.xlane.f32.xlu2 %v516_v26 }
 0x5d7   :  { %v511_v57 = vmul.f32 %v509_v27, %v1072_v10 }
 0x5d9   :  { %v513_v28 = vsub.f32 %v1151_v21, %v511_v57 }
 0x5db   :  { %v515_v2 = vmul.f32 %v513_v28, %v513_v28 }
 0x5dd   :  { %v519_v29 = vsel %vm67_vm0, %v515_v2, 0.0 }
 0x5de   :  { %520 = vadd.xlane.f32.xlu2 %v519_v29 }
 0x5e9   :  { %v684_v33 = vpop.permute.xlu0 %683 }
 0x5ea   :  { %696 = vmatpush.bf16.msrb.mxu0 %v684_v33 }
 0x5f6   :  { %656 = vrot.lane.b32.xlu2 %v811_v62, %s1015_s30 }
 0x5fe   :  { %710 = vrot.lane.b32.xlu2 %v811_v62, %s1025_s13 }
 0x649   :  { %v518_v31 = vpop.xlane.xlu2 %517 }
 0x64a   :  { %v522_v32 = vmul.f32 %v518_v31, %v1072_v10  ;;  %v655_v31 = vpop.permute.xlu1 %654 }
 0x64c   :  { %v524_v34 = vadd.f32 1e-05, %v522_v32 }
 0x64e   :  { %895 = vrsqrt.f32 %v524_v34  ;;  %vm532_vm12 = vweird.f32 %v524_v34 }
 0x651   :  { %v521_v35 = vpop.xlane.xlu2 %520 }
 0x652   :  { %v523_v36 = vmul.f32 %v521_v35, %v1072_v10  ;;  %v709_v32 = vpop.permute.xlu1 %708 }
 0x654   :  { %v896_v37 = vpop.eup %895  ;;  %v525_v38 = vadd.f32 1e-05, %v523_v36 }
 0x655   :  { %v527_v39 = vmul.f32 %v896_v37, %v524_v34  ;;  %vm533_vm11 = vweird.f32 %v896_v37 }
 0x656   :  { %897 = vrsqrt.f32 %v525_v38  ;;  %vm534_vm13 = vmor %vm532_vm12, %vm533_vm11  ;;  %vm542_vm15 = vweird.f32 %v525_v38 }
 0x657   :  { %v528_v40 = vmul.f32 %v896_v37, %v527_v39  ;;  %v856_v39 = vld [vmem:[#allocation5 + $0x5] ss:$0 sm:$0xff] }
 0x659   :  { %v529_v41 = vmul.f32 0.5, %v528_v40  ;;  %v657_v29 = vpop.permute.xlu2 %656 }
 0x65a   :  { %669 = vmatpush.bf16.msrb.mxu2 %v657_v29 }
 0x65b   :  { %v530_v42 = vsub.f32 1.5, %v529_v41 }
 0x65c   :  { %v898_v43 = vpop.eup %897 }
 0x65d   :  { %v531_v44 = vmul.f32 %v896_v37, %v530_v42  ;;  %v537_v45 = vmul.f32 %v898_v43, %v525_v38  ;;  %vm543_vm14 = vweird.f32 %v898_v43 }
 0x65e   :  { %vm544_vm1 = vmor %vm542_vm15, %vm543_vm14  ;;  %670 = vmatpush.bf16.msrb.mxu2 %v655_v31 }
 0x65f   :  { %v538_v46 = vmul.f32 %v898_v43, %v537_v45  ;;  %v535_v47 = vsel %vm534_vm13, %v896_v37, %v531_v44 }
 0x660   :  { %v546_v10 = vmul.f32 %v535_v47, %v512_v25 }
 0x661   :  { %v539_v48 = vmul.f32 0.5, %v538_v46  ;;  %v711_v30 = vpop.permute.xlu2 %710 }
 0x662   :  { %v549_v54 = vmul.f32 %v853_v50, %v546_v10  ;;  %723 = vmatpush.bf16.msrb.mxu1 %v711_v30 }
 0x663   :  { %v540_v49 = vsub.f32 1.5, %v539_v48 }
 0x664   :  { %v552_v58 = vadd.f32 %v854_v53, %v549_v54 }
 0x665   :  { %v541_v51 = vmul.f32 %v898_v43, %v540_v49 }
 0x666   :  { %724 = vmatpush.bf16.msrb.mxu1 %v709_v32 }
 0x667   :  { %v545_v52 = vsel %vm544_vm1, %v898_v43, %v541_v51 }
 0x668   :  { %v547_v55 = vmul.f32 %v545_v52, %v513_v28 }
 0x66a   :  { %v550_v56 = vmul.f32 %v853_v50, %v547_v55 }
 0x66c   :  { %v553_v59 = vadd.f32 %v854_v53, %v550_v56 }
 0x66e   :  { %v559_v60 = vpack.c.bf16 %v553_v59, %v552_v58 }
 0x670   :  { %791 = vmatmul.msk.bf16.vlgmr.msra.gmra.mxu1 %vm67_vm0, %v559_v60 }
 0x6ed   :  { %v585_v1 = vpop.f32.mrf.mxu1 }
 0x6ee   :  { %v586_v3 = vadd.f32 %v855_v63, %v585_v1 }
 0x6f0   :  { %v592_v4 = vmul.f32 0.044715, %v586_v3  ;;  %v590_v20 = vmul.f32 0.5, %v586_v3 }
 0x6f2   :  { %v594_v5 = vmul.f32 %v592_v4, %v586_v3 }
 0x6f4   :  { %v596_v6 = vmul.f32 %v594_v5, %v586_v3 }
 0x6f5   :  { %v587_v7 = vpop.f32.mrf.mxu1 }
 0x6f6   :  { %v598_v8 = vadd.f32 %v596_v6, %v586_v3  ;;  %v588_v9 = vadd.f32 %v855_v63, %v587_v7 }
 0x6f8   :  { %v600_v11 = vmul.f32 0.7978846, %v598_v8  ;;  %v593_v12 = vmul.f32 0.044715, %v588_v9  ;;  %v591_v24 = vmul.f32 0.5, %v588_v9 }
 0x6fa   :  { %899 = vtanh.f32 %v600_v11  ;;  %v595_v13 = vmul.f32 %v593_v12, %v588_v9 }
 0x6fc   :  { %v597_v14 = vmul.f32 %v595_v13, %v588_v9 }
 0x6fe   :  { %v599_v15 = vadd.f32 %v597_v14, %v588_v9 }
 0x700   :  { %v900_v16 = vpop.eup %899  ;;  %v601_v18 = vmul.f32 0.7978846, %v599_v15 }
 0x701   :  { %v604_v19 = vadd.f32 1.0, %v900_v16 }
 0x702   :  { %901 = vtanh.f32 %v601_v18 }
 0x703   :  { %v606_v22 = vmul.f32 %v604_v19, %v590_v20 }
 0x705   :  { %v608_v26 = vpack.c.bf16 %v606_v22, %v606_v22 }
 0x707   :  { %v617_v57 = vunpack.c.l.b16 %v608_v26 }
 0x708   :  { %v902_v23 = vpop.eup %901 }
 0x709   :  { %v605_v25 = vadd.f32 1.0, %v902_v23 }
 0x70b   :  { %v607_v0 = vmul.f32 %v605_v25, %v591_v24 }
 0x70d   :  { %v609_v27 = vpack.c.bf16 %v607_v0, %v607_v0 }
 0x70f   :  { %v618_v28 = vunpack.c.l.b16 %v609_v27 }
 0x711   :  { %v619_v2 = vpack.c.b16 %v618_v28, %v617_v57 }
 0x713   :  { %679 = vrot.lane.b32.xlu0 %v619_v2, %s1010_s27  ;;  %652 = vrot.lane.b32.xlu2 %v619_v2, %s1015_s30 }
 0x714   :  { %800 = vmatmul.msk.bf16.vlgmr.msra.gmra.mxu3 %vm67_vm0, %v619_v2 }
 0x71b   :  { %681 = vrot.lane.b32.xlu2 %v810_v61, %s1010_s27 }
 0x723   :  { %706 = vrot.lane.b32.xlu2 %v619_v2, %s1025_s13 }
 0x76d   :  { %v653_v34 = vpop.permute.xlu2 %652 }
 0x76e   :  { %801 = vmatmul.msk.bf16.vlgmr.msrb.gmra.mxu2 %vm67_vm0, %v653_v34 }
 0x775   :  { %v682_v35 = vpop.permute.xlu2 %681 }
 0x776   :  { %697 = vmatpush.bf16.msrb.mxu0 %v682_v35 }
 0x77d   :  { %v707_v36 = vpop.permute.xlu2 %706 }
 0x77e   :  { %803 = vmatmul.msk.bf16.vlgmr.msrb.gmra.mxu1 %vm67_vm0, %v707_v36 }
 0x785   :  { %v680_v37 = vpop.permute.xlu0 %679 }
 0x786   :  { %802 = vmatmul.msk.bf16.vlgmr.msrb.gmra.mxu0 %vm67_vm0, %v680_v37 }
 0x797   :  { %v644_v38 = vpop.f32.mrf.mxu3 }
 0x798   :  { %v650_v41 = vadd.f32 %v856_v39, %v644_v38 }
 0x79f   :  { %v646_v46 = vpop.f32.mrf.mxu3 }
 0x7a0   :  { %v651_v49 = vadd.f32 %v856_v39, %v646_v46 }
 0x7f1   :  { %v672_v40 = vpop.f32.mrf.mxu2 }
 0x7f2   :  { %v677_v42 = vadd.f32 %v672_v40, %v650_v41 }
 0x7f9   :  { %v674_v48 = vpop.f32.mrf.mxu2 }
 0x7fa   :  { %v678_v10 = vadd.f32 %v674_v48, %v651_v49 }
 0x7fb   :  { %v726_v43 = vpop.f32.mrf.mxu1 }
 0x803   :  { %v699_v44 = vpop.f32.mrf.mxu0  ;;  %v728_v53 = vpop.f32.mrf.mxu1 }
 0x804   :  { %v704_v45 = vadd.f32 %v699_v44, %v677_v42 }
 0x806   :  { %v731_v47 = vadd.f32 %v726_v43, %v704_v45 }
 0x808   :  { %v733_v50 = vadd.f32 %v731_v47, %v1146_v17 }
 0x80a   :  { %735 = vst.msk [vmem:[#allocation8] sm:$0xff] %vm67_vm0, %v733_v50 }
 0x80b   :  { %v701_v51 = vpop.f32.mrf.mxu0 }
 0x80c   :  { %v705_v52 = vadd.f32 %v701_v51, %v678_v10 }
 0x80e   :  { %v732_v54 = vadd.f32 %v728_v53, %v705_v52 }
 0x810   :  { %v734_v55 = vadd.f32 %v732_v54, %v1151_v21 }
 0x812   :  { %736 = vst.msk [vmem:[#allocation8 + $0x8] sm:$0xff] %vm67_vm0, %v734_v55 }
 0x813   :  { %749 = dma.vmem_to_hbm [thread:$0]  %s742_s15, 256, %s744_s18, [#allocation4], %s1006_s20, %s1006_s20, %s1007_s21  }
 0x814   :  { %1003 = dma.done.wait [#allocation4], 256  }
 0x815   :  { %1004 = vsyncadd [#allocation4], 4294967040 }
 0x816   :  { %754 = vsyncpa [#allocation3], 1 }
 0x817   :  { %755 = vsyncpa [#allocation6], 1 }
 0x818   :  { %756 = vsyncpa [#allocation4], 1 }

</bundles_post_ra>
